<compile_context>
chip_gen: v7x
topology: tpu7x:2x2x1
jax: 0.10.0
libtpu: 0.0.40
codegen_flags: <defaults>
</compile_context>

<pallas_src>
import functools

import jax
import jax.numpy as jnp
from jax.experimental import pallas as pl
from jax.experimental.pallas import tpu as pltpu

_LANE = 128
_SUBLANE = 8
_X_BLOCK_BUDGET = 8 * 1024 * 1024   # target bytes per (lane-padded) x buffer
_TILE_N_MIN = 1024
_TILE_N_MAX = 32768


def _round_up(v, m):
    return pl.cdiv(v, m) * m


def _choose_tiles(n, d):
    """Byte-based, generation-portable tile sizes: (tile_n rows, tile_d feats)."""
    d_pad = _round_up(d, _LANE)

    # Feature chunk: keep even the minimum row tile inside the byte budget.
    # tile_d is a multiple of 128 (lane dim) unless it equals the full D.
    max_tile_d = max(_LANE, (_X_BLOCK_BUDGET // (4 * _TILE_N_MIN)) // _LANE * _LANE)
    if d_pad <= max_tile_d:
        tile_d = d                    # single full-width D block (grid_d == 1)
        tile_d_pad = d_pad
    else:
        tile_d = max_tile_d           # tiled reduction over D
        tile_d_pad = max_tile_d

    # Row tile sized by bytes of the lane-padded f32 block (not by row count).
    t = _X_BLOCK_BUDGET // (4 * tile_d_pad)
    t = max(_TILE_N_MIN, min(_TILE_N_MAX, (t // _LANE) * _LANE))

    n8 = _round_up(n, _SUBLANE)
    # Keep grid_n >= 2 when there is enough data so both v7x TensorCores stream.
    if n8 >= 2 * _TILE_N_MIN:
        t = min(t, max(_TILE_N_MIN, (n8 // 2 // _LANE) * _LANE))
    # Never tile past the data (grid_n == 1 in that case, so non-128-multiple
    # tile_n still satisfies the BlockSpec full-dim rule).
    t = min(t, n8)
    return t, tile_d, tile_d_pad


def _logreg_kernel(x_ref, w_ref, o_ref, acc_ref, *, d_total, tile_d):
    # x_ref: (tile_n, tile_d)   w_ref: (1, tile_d)   o_ref/acc_ref: (1, tile_n)
    k = pl.program_id(1)

    @pl.when(k == 0)
    def _():
        acc_ref[...] = jnp.zeros_like(acc_ref)

    x = x_ref[...].astype(jnp.float32)
    w = w_ref[...].astype(jnp.float32)                       # broadcasts over rows
    # Mask lanes past the true feature dim (ragged last D block): padded-lane
    # garbage must never reach the reduction.  All-true for non-last blocks.
    lane = jax.lax.broadcasted_iota(jnp.int32, (1, tile_d), 1)
    valid = lane < (d_total - k * tile_d)
    prod = jnp.where(valid, x * w, 0.0)                      # VPU
    partial = jnp.sum(prod, axis=-1, keepdims=True)          # XLU lane reduce -> (tile_n, 1)
    acc_ref[...] += partial.T                                # lane-dense accumulator

    @pl.when(k == pl.num_programs(1) - 1)
    def _():
        # EUP sigmoid + lane-dense full-width store.
        o_ref[...] = jax.nn.sigmoid(acc_ref[...]).astype(o_ref.dtype)


def sps_logreg_forward(x, weight):
    """x: [N, D] float32, weight: [1, D] float32 -> [N] float32 = sigmoid(x @ w.T)."""
    N, D = x.shape
    assert weight.shape == (1, D)

    tile_n, tile_d, tile_d_pad = _choose_tiles(N, D)
    grid_n = pl.cdiv(N, tile_n)
    grid_d = pl.cdiv(D, tile_d)
    n_out = grid_n * tile_n                      # tiny padded output, sliced below

    # VMEM accounting (lane/sublane padded) -> raise the scoped limit to match.
    out_lane = _round_up(tile_n, _LANE)
    block_x = tile_n * tile_d_pad * 4
    block_w = _SUBLANE * tile_d_pad * 4
    block_o = _SUBLANE * out_lane * 4
    vmem_need = 2 * block_x + 2 * block_w + 2 * block_o + block_o   # dbl-bufs + acc
    vmem_limit = int(min(max(vmem_need + (8 << 20), 32 << 20), 48 << 20))

    kernel = functools.partial(_logreg_kernel, d_total=D, tile_d=tile_d)

    out = pl.pallas_call(
        kernel,
        out_shape=jax.ShapeDtypeStruct((1, n_out), jnp.float32),
        grid_spec=pltpu.PrefetchScalarGridSpec(
            num_scalar_prefetch=0,
            grid=(grid_n, grid_d),               # reduction axis (D) last
            in_specs=[
                # streaming x tile: new block each step -> pipelined DMA
                pl.BlockSpec((tile_n, tile_d), lambda i, k: (i, k)),
                # weight chunk: constant across rows, advances only along D
                pl.BlockSpec((1, tile_d), lambda i, k: (0, k)),
            ],
            # lane-dense output block, same block index across the reduction axis
            out_specs=pl.BlockSpec((1, tile_n), lambda i, k: (0, i)),
            scratch_shapes=[pltpu.VMEM((1, tile_n), jnp.float32)],
        ),
        compiler_params=pltpu.CompilerParams(
            dimension_semantics=("parallel", "arbitrary"),
            vmem_limit_bytes=vmem_limit,
        ),
        cost_estimate=pl.CostEstimate(
            flops=2 * N * D,
            transcendentals=N,
            bytes_accessed=4 * (N * D + D + N),
        ),
    )(x, weight)

    # PyTorch returns y_pred[:, 0] -> shape [N]; drop grid padding.
    return out[0, :N]


if __name__ == "__main__":
    # Small shapes consistent with the module: batch N=8, feature dim D=32.
    N, D = 8, 32

    key = jax.random.PRNGKey(0)
    kx, kw = jax.random.split(key)

    x = jax.random.normal(kx, (N, D), dtype=jnp.float32)
    # Deterministic "Linear(D, 1, bias=False)" weight init (synthetic).
    weight = jax.random.uniform(
        kw, (1, D), dtype=jnp.float32,
        minval=-1.0 / jnp.sqrt(D), maxval=1.0 / jnp.sqrt(D))

    y = sps_logreg_forward(x, weight)
    jax.block_until_ready(y)

    # Sanity check against plain JAX reference.
    y_ref = jax.nn.sigmoid(x @ weight.T)[:, 0]
    assert y.shape == (N,)
    assert jnp.allclose(y, y_ref, atol=1e-5, rtol=1e-5)

    print("KERNEL_OK")
</pallas_src>

<mosaic_0001>
module attributes {stable_mosaic.version = 11 : i64} {
  func.func @_logreg_kernel(%arg0: i32, %arg1: i32, %arg2: memref<8x32xf32, #tpu.memory_space<vmem>>, %arg3: memref<1x32xf32, #tpu.memory_space<vmem>>, %arg4: memref<1x8xf32, #tpu.memory_space<vmem>>, %arg5: memref<1x8xf32, #tpu.memory_space<vmem>>) attributes {dimension_semantics = [#tpu.dimension_semantics<parallel>, #tpu.dimension_semantics<arbitrary>], iteration_bounds = array<i64: 1, 1>, scalar_prefetch = 0 : i64, scratch_operands = 1 : i64, tpu.core_type = #tpu.core_type<tc>, window_params = [{transform_indices = @transform_0, window_bounds = array<i64: 8, 32>}, {transform_indices = @transform_1, window_bounds = array<i64: 1, 32>}, {transform_indices = @transform_2, window_bounds = array<i64: 1, 8>}]} {
    %c0_i32 = arith.constant 0 : i32
    %0 = arith.cmpi eq, %arg1, %c0_i32 : i32
    %1 = arith.extui %0 : i1 to i32
    %c0_i32_0 = arith.constant 0 : i32
    %2 = arith.cmpi ne, %1, %c0_i32_0 : i32
    scf.if %2 {
      %cst_12 = arith.constant 0.000000e+00 : f32
      %25 = vector.broadcast %cst_12 : f32 to vector<1x8xf32>
      %c0_13 = arith.constant 0 : index
      %c0_14 = arith.constant 0 : index
      %26 = vector.load %arg5[%c0_13, %c0_14] : memref<1x8xf32, #tpu.memory_space<vmem>>, vector<1x8xf32>
      tpu.vector_store %arg5[%c0_13, %c0_14], %25 {strides = array<i32>} : memref<1x8xf32, #tpu.memory_space<vmem>>, vector<1x8xf32>,
    } else {
    }
    %c0 = arith.constant 0 : index
    %c0_1 = arith.constant 0 : index
    %3 = vector.load %arg2[%c0, %c0_1] : memref<8x32xf32, #tpu.memory_space<vmem>>, vector<8x32xf32>
    %c0_2 = arith.constant 0 : index
    %c0_3 = arith.constant 0 : index
    %4 = vector.load %arg3[%c0_2, %c0_3] : memref<1x32xf32, #tpu.memory_space<vmem>>, vector<1x32xf32>
    %5 = tpu.iota {dimensions = array<i32: 1>} : vector<1x32xi32>
    %c32_i32 = arith.constant 32 : i32
    %6 = arith.muli %arg1, %c32_i32 : i32
    %c32_i32_4 = arith.constant 32 : i32
    %7 = arith.subi %c32_i32_4, %6 : i32
    %8 = vector.broadcast %7 : i32 to vector<1x32xi32>
    %9 = arith.cmpi slt, %5, %8 : vector<1x32xi32>
    %10 = vector.broadcast %4 : vector<1x32xf32> to vector<8x32xf32>
    %11 = arith.mulf %3, %10 : vector<8x32xf32>
    %cst = arith.constant 0.000000e+00 : f32
    %12 = vector.shape_cast %9 : vector<1x32xi1> to vector<1x32xi1>
    %13 = vector.broadcast %12 : vector<1x32xi1> to vector<8x32xi1>
    %14 = vector.broadcast %cst : f32 to vector<8x32xf32>
    %15 = arith.select %13, %11, %14 : vector<8x32xi1>, vector<8x32xf32>
    %cst_5 = arith.constant dense<0.000000e+00> : vector<8xf32>
    %16 = vector.multi_reduction <add>, %15, %cst_5 [1] : vector<8x32xf32> to vector<8xf32>
    %17 = vector.shape_cast %16 : vector<8xf32> to vector<8x1xf32>
    %c0_6 = arith.constant 0 : index
    %c0_7 = arith.constant 0 : index
    %18 = vector.load %arg5[%c0_6, %c0_7] : memref<1x8xf32, #tpu.memory_space<vmem>>, vector<1x8xf32>
    %19 = tpu.transpose %17, [1, 0] : vector<8x1xf32> -> vector<1x8xf32>
    %20 = arith.addf %18, %19 : vector<1x8xf32>
    %c0_8 = arith.constant 0 : index
    %c0_9 = arith.constant 0 : index
    %21 = vector.load %arg5[%c0_8, %c0_9] : memref<1x8xf32, #tpu.memory_space<vmem>>, vector<1x8xf32>
    tpu.vector_store %arg5[%c0_8, %c0_9], %20 {strides = array<i32>} : memref<1x8xf32, #tpu.memory_space<vmem>>, vector<1x8xf32>,
    %c0_i32_10 = arith.constant 0 : i32
    %22 = arith.cmpi eq, %arg1, %c0_i32_10 : i32
    %23 = arith.extui %22 : i1 to i32
    %c0_i32_11 = arith.constant 0 : i32
    %24 = arith.cmpi ne, %23, %c0_i32_11 : i32
    scf.if %24 {
      %c0_12 = arith.constant 0 : index
      %c0_13 = arith.constant 0 : index
      %25 = vector.load %arg5[%c0_12, %c0_13] : memref<1x8xf32, #tpu.memory_space<vmem>>, vector<1x8xf32>
      %26 = arith.negf %25 : vector<1x8xf32>
      %27 = math.exp %26 : vector<1x8xf32>
      %cst_14 = arith.constant 1.000000e+00 : f32
      %28 = vector.broadcast %cst_14 : f32 to vector<1x8xf32>
      %29 = arith.addf %28, %27 : vector<1x8xf32>
      %30 = arith.divf %28, %29 : vector<1x8xf32>
      %c0_15 = arith.constant 0 : index
      %c0_16 = arith.constant 0 : index
      %31 = vector.load %arg4[%c0_15, %c0_16] : memref<1x8xf32, #tpu.memory_space<vmem>>, vector<1x8xf32>
      tpu.vector_store %arg4[%c0_15, %c0_16], %30 {strides = array<i32>} : memref<1x8xf32, #tpu.memory_space<vmem>>, vector<1x8xf32>,
    } else {
    }
    return
  }
  func.func @transform_0(%arg0: i32, %arg1: i32) -> (i32, i32) {
    %c0_i32 = arith.constant 0 : i32
    return %arg0, %arg1 : i32, i32
  }
  func.func @transform_1(%arg0: i32, %arg1: i32) -> (i32, i32) {
    %c0_i32 = arith.constant 0 : i32
    %c0_i32_0 = arith.constant 0 : i32
    return %c0_i32, %arg1 : i32, i32
  }
  func.func @transform_2(%arg0: i32, %arg1: i32) -> (i32, i32) {
    %c0_i32 = arith.constant 0 : i32
    %c0_i32_0 = arith.constant 0 : i32
    return %c0_i32, %arg0 : i32, i32
  }
}

</mosaic_0001>

<bundles_post_ra>
// kernel: tpu_custom_call.1
= control target key start
LH: loop header
LB: loop body
LE: loop exit
PB: predicated region body
PF: predicated region fallthrough
CT: control target
= control target key end

     0   :  { %7 = vsyncpa [#allocation4], 0  ;;  %s219_s0 = inlined_call_operand.hbm [shape: f32[8,32], index: 0, kind: input, shape index: {}]   ;;  %s220_s1 = inlined_call_operand.vmem [shape: f32[1,32], index: 1, kind: input, shape index: {}]   ;;  %s221_s2 = inlined_call_operand.hbm [shape: f32[1,8], index: 2, kind: output, shape index: {}]  }
   0x1   :  { %8 = vsyncpa [#allocation5], 0  ;;  %s171_s9 = smov [#allocation3]   ;;  %s123_s13 = scalar_lea.hbm %s219_s0, 128 }
   0x2   :  { %s15_s10 = sshll.u32 %s171_s9, 4  ;;  %p124_p0 = scmp.ne.s32.totalorder %s219_s0, %s123_s13  ;;  %s16_s10 = int_to_ptr.vmem [resolvable:$true] %s15_s10 }
   0x3   :  { %p127_p1 = scmp.lt.u32.totalorder %s123_s13, %s219_s0 }
   0x5   :  { %p129_p2 = pnand %p127_p1, %p124_p0 }
   0x7   :  { %132 = shalt.err (!%p129_p2)
}
   0x8   :  { %s133_s18 = scalar_lea.vmem %s16_s10, 128  ;;  %p138_p4 = scmp.lt.s32.totalorder %s16_s10, %s16_s10 }
   0x9   :  { %p134_p3 = scmp.ne.s32.totalorder %s16_s10, %s133_s18  ;;  %p139_p5 = scmp.lt.s32.totalorder %s133_s18, %s133_s18 }
   0xb   :  { %p140_p6 = por %p139_p5, %p138_p4 }
   0xd   :  { %p141_p7 = pnand %p140_p6, %p134_p3 }
   0xf   :  { %144 = shalt.err (!%p141_p7)
}
  0x10   :  { %18 = dma.hbm_to_vmem [thread:$0]  %s219_s0, 128, %s16_s10, [#allocation4]  }
  0x11   :  { %167 = dma.done.wait [#allocation4], 128  }
  0x12   :  { %168 = vsyncadd [#allocation4], 4294967168  ;;  %v32_v0 = vlaneseq  ;;  %v30_v2 = vld [vmem:[#allocation3] sm:$0xff]  ;;  %v114_v3 = vld [vmem:[%s220_s1] ss:$0 sm:$0xff]  ;;  %vm48_vm1 = vcmask 261120  }
  0x13   :  { %v44_v4 = vmul.f32 %v114_v3, %v30_v2  ;;  %vm28_vm2 = vcmask 57344   ;;  %v172_v7 = vmov 0.0   ;;  %s173_s0 = smov [#allocation6]  }
  0x14   :  { %v33_v1 = vand.u32 127, %v32_v0  ;;  %29 = vst.msk [vmem:[#allocation2] sm:$0x1] %vm28_vm2, %v172_v7  ;;  %s105_s1 = sshll.u32 %s173_s0, 4  ;;  %s106_s1 = int_to_ptr.vmem [resolvable:$true] %s105_s1 }
  0x15   :  { %s145_s23 = scalar_lea.vmem %s106_s1, 16  ;;  %s149_s24 = scalar_lea.vmem %s106_s1, 32 }
  0x16   :  { %vm37_vm0 = vcmp.lt.s32.totalorder %v33_v1, 32  ;;  %p146_p8 = scmp.ne.s32.totalorder %s106_s1, %s145_s23  ;;  %p150_p9 = scmp.lt.s32.totalorder %s106_s1, %s106_s1 }
  0x17   :  { %v47_v5 = vsel %vm37_vm0, %v44_v4, 0.0  ;;  %p151_p10 = scmp.lt.s32.totalorder %s149_s24, %s145_s23 }
  0x18   :  { %v49_v6 = vsel %vm48_vm1, %v47_v5, 0.0 }
  0x19   :  { %50 = vadd.xlane.f32.xlu0 %v49_v6  ;;  %p152_p11 = por %p151_p10, %p150_p9 }
  0x1b   :  { %v52_v9 = vld [vmem:[#allocation2] sm:$0x1]  ;;  %p153_p12 = pnand %p152_p11, %p146_p8 }
  0xa6   :  { %v51_v8 = vpop.xlane.xlu0 %50 }
  0xa7   :  { %53 = vxpose.xlu0.b32.start.end [1/1] (short) (narrow) %v51_v8, 8 }
 0x127   :  { %v69_v10 = vpop.trf.xlu0 }
 0x128   :  { %v85_v11 = vadd.f32 %v69_v10, %v52_v9 }
 0x12a   :  { %87 = vst.msk [vmem:[#allocation2] sm:$0x1] %vm28_vm2, %v85_v11 }
 0x131   :  { %v91_v12 = vld [vmem:[#allocation2] sm:$0x1] }
 0x132   :  { %v115_v13 = vmul.f32 -1.442695, %v91_v12 }
 0x134   :  { %119 = vpow2.f32 %v115_v13 }
 0x13e   :  { %v120_v14 = vpop.eup %119 }
 0x13f   :  { %v95_v15 = vadd.f32 1.0, %v120_v14 }
 0x141   :  { %121 = vrcp.f32 %v95_v15 }
 0x14b   :  { %v122_v16 = vpop.eup %121 }
 0x14c   :  { %98 = vst.msk [vmem:[#allocation6] sm:$0x1] %vm28_vm2, %v122_v16 }
 0x14d   :  { %156 = shalt.err (!%p153_p12)
}
 0x14e   :  { %s157_s27 = scalar_lea.hbm %s221_s2, 16 }
 0x14f   :  { %p158_p13 = scmp.ne.s32.totalorder %s221_s2, %s157_s27  ;;  %p161_p0 = scmp.lt.u32.totalorder %s157_s27, %s221_s2 }
 0x151   :  { %p163_p1 = pnand %p161_p0, %p158_p13 }
 0x153   :  { %166 = shalt.err (!%p163_p1)
}
 0x154   :  { %108 = dma.vmem_to_hbm [thread:$0]  %s106_s1, 16, %s221_s2, [#allocation5]  }
 0x155   :  { %169 = dma.done.wait [#allocation5], 16  }
 0x156   :  { %170 = vsyncadd [#allocation5], 4294967280 }
 0x157   :  { %112 = vsyncpa [#allocation4], 1 }
 0x158   :  { %113 = vsyncpa [#allocation5], 1 }

</bundles_post_ra>
